<compile_context>
chip_gen: v6e
topology: v6e:2x2x1
jax: 0.10.0
libtpu: 0.0.40
codegen_flags: <defaults>
</compile_context>

<pallas_src>
import functools

import jax
import jax.numpy as jnp
from jax.experimental import pallas as pl
from jax.experimental.pallas import tpu as pltpu


# ---------------------------------------------------------------------------
# VMEM sizing helpers (generation aware, hardware-tile padded)
# ---------------------------------------------------------------------------

def _round_up(x, m):
    return -(-x // m) * m


def _padded_bytes(shape, itemsize):
    """VMEM footprint of a buffer: lane (last) dim rounded up to 128, sublane
    (second-to-last) dim rounded up to 8 (f32) / 16 (bf16) / 32 (int8)."""
    shape = tuple(int(s) for s in shape)
    if not shape:
        return itemsize
    sublane_tile = {4: 8, 2: 16, 1: 32}.get(itemsize, 8)
    lane = _round_up(shape[-1], 128)
    sub = _round_up(shape[-2], sublane_tile) if len(shape) >= 2 else 1
    outer = 1
    for s in shape[:-2]:
        outer *= s
    return outer * sub * lane * itemsize


def _vmem_budget_and_limit():
    """(working-set budget, vmem_limit_bytes) derived from physical VMEM.
    64 MiB/TC on v7x -> ~38/48 MiB; 128 MiB on v5e/v6e -> ~77/96 MiB."""
    cap = 64 * 1024 * 1024  # conservative fallback (v7x-sized, safe everywhere)
    try:
        info = pltpu.get_tpu_info()
        for name in ("vmem_capacity_bytes", "vmem_bytes", "vmem_size_bytes"):
            v = getattr(info, name, None)
            if v:
                cap = int(v)
                break
    except Exception:
        pass
    limit = min(cap * 3 // 4, cap - 8 * 1024 * 1024)
    budget = limit * 4 // 5  # headroom for compiler-internal temporaries
    return budget, limit


def _weight_bytes(C, itemsize, bufs):
    return bufs * (_padded_bytes((9 * C, C), itemsize)
                   + _padded_bytes((C, C), itemsize)
                   + 2 * _padded_bytes((1, C), itemsize))


def _pick_tile_h(H, W, C, d, itemsize, *, batch, budget, use_im2col,
                 weight_bufs, target_steps=8):
    """Largest row tile TH that (a) divides H, (b) is a multiple of d whenever
    we actually tile (halo blocks must be block-aligned), (c) fits the padded,
    double-buffered VMEM working set; prefer enough (and an even number of)
    grid steps for pipelining / megacore balance."""
    def fits(th):
        io = 2 * (_padded_bytes((1, th, W, C), itemsize)          # centre in
                  + 2 * _padded_bytes((1, d, W, C), itemsize)     # top+bot halos
                  + _padded_bytes((1, th, W, C), itemsize))       # output
        wts = _weight_bytes(C, itemsize, weight_bufs)
        scratch = _padded_bytes((th + 2 * d, W + 2 * d, C), itemsize)
        if use_im2col:
            scratch += _padded_bytes((th * W, 9 * C), itemsize)
        f32tmp = 2 * _padded_bytes((th * W, C), 4)                # f32 matmul results
        return io + wts + scratch + f32tmp <= budget

    cands = [th for th in range(1, H + 1)
             if H % th == 0 and (th == H or th % d == 0)]
    fitting = [th for th in cands if fits(th)] or [min(cands)]
    min_tiles = max(1, -(-target_steps // max(batch, 1)))
    preferred = [th for th in fitting if H // th >= min_tiles] or fitting
    even = [th for th in preferred if (batch * (H // th)) % 2 == 0] or preferred
    return max(even)


# ---------------------------------------------------------------------------
# Kernel
# ---------------------------------------------------------------------------

def _dcl_kernel(x_ref, top_ref, bot_ref, w3_ref, b3_ref, w1_ref, b1_ref,
                o_ref, xp_ref, *col_scratch, d, TH, W, C, use_im2col):
    """One grid step == (batch b, row-tile i).  NHWC layout.

    x_ref  : (1, TH, W, C)    centre rows of the tile (also the residual)
    top_ref: (1, d,  W, C)    d rows just above the tile (clamped at i==0)
    bot_ref: (1, d,  W, C)    d rows just below the tile (clamped at i==nH-1)
    w3_ref : (9*C, C)         3x3 conv weight, rows ordered (kh*3+kw)*C + c_in
    b3_ref : (1, C)
    w1_ref : (C, C)           1x1 conv weight, (c_in, c_out)
    b1_ref : (1, C)
    o_ref  : (1, TH, W, C)
    xp_ref : (TH+2d, W+2d, C) VMEM scratch: zero-padded input tile
    col_scratch (im2col path only): (TH*W, 9*C) VMEM scratch
    """
    i = pl.program_id(1)
    n_rows = pl.num_programs(1)

    # ---- stage the zero-padded input tile in VMEM -------------------------
    # left / right zero borders (width d); re-written every step (no cross-step
    # state, safe under "parallel" grid semantics).
    xp_ref[:, 0:d, :] = jnp.zeros((TH + 2 * d, d, C), xp_ref.dtype)
    xp_ref[:, d + W:, :] = jnp.zeros((TH + 2 * d, d, C), xp_ref.dtype)

    # top halo: previous tile's last d rows, or zeros at the image border
    @pl.when(i == 0)
    def _():
        xp_ref[0:d, d:d + W, :] = jnp.zeros((d, W, C), xp_ref.dtype)

    @pl.when(i > 0)
    def _():
        xp_ref[0:d, d:d + W, :] = top_ref[0]

    # bottom halo: next tile's first d rows, or zeros at the image border
    @pl.when(i == n_rows - 1)
    def _():
        xp_ref[d + TH:, d:d + W, :] = jnp.zeros((d, W, C), xp_ref.dtype)

    @pl.when(i < n_rows - 1)
    def _():
        xp_ref[d + TH:, d:d + W, :] = bot_ref[0]

    # centre rows
    xp_ref[d:d + TH, d:d + W, :] = x_ref[0]

    def tap(kh, kw):
        # shifted (TH, W, C) window, flattened to (TH*W, C) for a plain matmul
        return xp_ref[kh * d:kh * d + TH, kw * d:kw * d + W, :].reshape(TH * W, C)

    # ---- dilated 3x3 conv: contraction structure chosen per channel count ---
    if use_im2col:
        # Small C: one (TH*W, 9C) x (9C, C) contraction (K = 9C fills the MXU).
        col_ref = col_scratch[0]
        for kh in range(3):
            for kw in range(3):
                k = kh * 3 + kw
                col_ref[:, k * C:(k + 1) * C] = tap(kh, kw)
        h = jnp.dot(col_ref[...], w3_ref[...],
                    preferred_element_type=jnp.float32)          # (TH*W, C) f32
    else:
        # Large C: 9 accumulating matmuls straight from the padded tile; no
        # 9x-tile im2col scratch and no extra full-tile VMEM stores.
        h = jnp.zeros((TH * W, C), jnp.float32)
        for kh in range(3):
            for kw in range(3):
                k = kh * 3 + kw
                h = h + jnp.dot(tap(kh, kw), w3_ref[k * C:(k + 1) * C, :],
                                preferred_element_type=jnp.float32)

    # ---- bias -> ReLU -> conv1x1 -> bias -> residual (f32 epilogue) ---------
    h = jnp.maximum(h + b3_ref[0].astype(jnp.float32), 0.0)
    w1 = w1_ref[...]
    y = jnp.dot(h.astype(w1.dtype), w1,
                preferred_element_type=jnp.float32)              # (TH*W, C) f32
    y = y + b1_ref[0].astype(jnp.float32)
    out = x_ref[0].astype(jnp.float32) + y.reshape(TH, W, C)
    o_ref[0] = out.astype(o_ref.dtype)


# ---------------------------------------------------------------------------
# Wrappers
# ---------------------------------------------------------------------------

def dcl_forward_nhwc(x_nhwc, w3_kkio, b3, w1_io, b1, *, dilation):
    """x_nhwc: (B, H, W, C); w3_kkio: (3,3,Cin,Cout); w1_io: (Cin,Cout)."""
    B, H, W, C = x_nhwc.shape
    d = dilation
    itemsize = x_nhwc.dtype.itemsize

    use_im2col = C <= 128            # per-C contraction-structure choice
    budget, vmem_limit = _vmem_budget_and_limit()

    # Constant-index weights: single-buffer them only when they are large
    # enough to matter (w3 alone can be multiple MiB at bf16 C>=256).
    single_buffer_weights = _weight_bytes(C, itemsize, 1) >= (1 << 20)
    weight_bufs = 1 if single_buffer_weights else 2

    TH = _pick_tile_h(H, W, C, d, itemsize, batch=B, budget=budget,
                      use_im2col=use_im2col, weight_bufs=weight_bufs)
    n_h = H // TH
    th_blk = TH // d if TH % d == 0 else 1   # only used when n_h > 1 (then d | TH)
    n_d_blocks = pl.cdiv(H, d)

    w3_flat = w3_kkio.reshape(9 * C, C)      # rows ordered (kh*3+kw)*C + c_in
    b3_2d = b3.reshape(1, C)
    b1_2d = b1.reshape(1, C)

    kernel = functools.partial(_dcl_kernel, d=d, TH=TH, W=W, C=C,
                               use_im2col=use_im2col)

    def center_map(b, i):
        return (b, i, 0, 0)

    def top_map(b, i):
        # d rows ending at row i*TH (block size d); clamped at the top border
        return (b, jnp.maximum(i * th_blk - 1, 0), 0, 0)

    def bot_map(b, i):
        # d rows starting at row (i+1)*TH; clamped at the bottom border
        return (b, jnp.minimum((i + 1) * th_blk, n_d_blocks - 1), 0, 0)

    def const_spec(shape):
        idx_map = lambda b, i, _n=len(shape): (0,) * _n
        if single_buffer_weights:
            return pl.BlockSpec(shape, idx_map, pipeline_mode=pl.Buffered(1))
        return pl.BlockSpec(shape, idx_map)

    scratch_shapes = [pltpu.VMEM((TH + 2 * d, W + 2 * d, C), x_nhwc.dtype)]
    if use_im2col:
        scratch_shapes.append(pltpu.VMEM((TH * W, 9 * C), x_nhwc.dtype))

    return pl.pallas_call(
        kernel,
        out_shape=jax.ShapeDtypeStruct((B, H, W, C), x_nhwc.dtype),
        grid_spec=pltpu.PrefetchScalarGridSpec(
            num_scalar_prefetch=0,
            grid=(B, n_h),
            in_specs=[
                pl.BlockSpec((1, TH, W, C), center_map),
                pl.BlockSpec((1, d, W, C), top_map),
                pl.BlockSpec((1, d, W, C), bot_map),
                const_spec((9 * C, C)),
                const_spec((1, C)),
                const_spec((C, C)),
                const_spec((1, C)),
            ],
            out_specs=pl.BlockSpec((1, TH, W, C), center_map),
            scratch_shapes=scratch_shapes,
        ),
        compiler_params=pltpu.CompilerParams(
            dimension_semantics=("parallel", "parallel"),
            vmem_limit_bytes=vmem_limit),
    )(x_nhwc, x_nhwc, x_nhwc, w3_flat, b3_2d, w1_io, b1_2d)


@functools.partial(jax.jit, static_argnames=("dilation",))
def dcl_forward_nchw(x_nchw, w3_oihw, b3, w1_oihw, b1, *, dilation):
    """Matches the PyTorch module: NCHW activations, OIHW conv weights."""
    C = x_nchw.shape[1]
    x_nhwc = jnp.transpose(x_nchw, (0, 2, 3, 1))
    w3_kkio = jnp.transpose(w3_oihw, (2, 3, 1, 0))         # (kh, kw, c_in, c_out)
    w1_io = jnp.transpose(w1_oihw.reshape(C, C), (1, 0))   # (c_in, c_out)
    y = dcl_forward_nhwc(x_nhwc, w3_kkio, b3, w1_io, b1, dilation=dilation)
    return jnp.transpose(y, (0, 3, 1, 2))


def dcl_reference_nchw(x_nchw, w3_oihw, b3, w1_oihw, b1, *, dilation):
    """Pure-JAX reference using lax.conv_general_dilated (NCHW, OIHW)."""
    C = x_nchw.shape[1]
    h = jax.lax.conv_general_dilated(
        x_nchw, w3_oihw, window_strides=(1, 1),
        padding=((dilation, dilation), (dilation, dilation)),
        rhs_dilation=(dilation, dilation),
        dimension_numbers=("NCHW", "OIHW", "NCHW"))
    h = jnp.maximum(h + b3.reshape(1, C, 1, 1), 0.0)
    y = jax.lax.conv_general_dilated(
        h, w1_oihw, window_strides=(1, 1), padding="VALID",
        dimension_numbers=("NCHW", "OIHW", "NCHW"))
    y = y + b1.reshape(1, C, 1, 1)
    return x_nchw + y


if __name__ == "__main__":
    B, C, H, W = 2, 4, 16, 16
    stride = 2  # DCl's `stride` arg == dilation == padding

    key = jax.random.PRNGKey(0)
    kx, k1, k2, k3, k4 = jax.random.split(key, 5)

    x = jax.random.normal(kx, (B, C, H, W), dtype=jnp.float32)
    # nn.Conv2d weight layouts: (C_out, C_in, kH, kW)
    w3 = jax.random.normal(k1, (C, C, 3, 3), dtype=jnp.float32) * 0.1
    b3 = jax.random.normal(k2, (C,), dtype=jnp.float32) * 0.1
    w1 = jax.random.normal(k3, (C, C, 1, 1), dtype=jnp.float32) * 0.1
    b1 = jax.random.normal(k4, (C,), dtype=jnp.float32) * 0.1

    out = jax.block_until_ready(
        dcl_forward_nchw(x, w3, b3, w1, b1, dilation=stride))
    ref = jax.block_until_ready(
        dcl_reference_nchw(x, w3, b3, w1, b1, dilation=stride))

    assert out.shape == (B, C, H, W)
    max_err = float(jnp.max(jnp.abs(out - ref)))
    assert jnp.allclose(out, ref, rtol=1e-4, atol=1e-4), max_err

    print("KERNEL_OK")
</pallas_src>

<mosaic_0001>
module attributes {stable_mosaic.version = 11 : i64} {
  func.func @_dcl_kernel(%arg0: i32, %arg1: i32, %arg2: memref<1x4x16x4xf32, #tpu.memory_space<vmem>>, %arg3: memref<1x2x16x4xf32, #tpu.memory_space<vmem>>, %arg4: memref<1x2x16x4xf32, #tpu.memory_space<vmem>>, %arg5: memref<36x4xf32, #tpu.memory_space<vmem>>, %arg6: memref<1x4xf32, #tpu.memory_space<vmem>>, %arg7: memref<4x4xf32, #tpu.memory_space<vmem>>, %arg8: memref<1x4xf32, #tpu.memory_space<vmem>>, %arg9: memref<1x4x16x4xf32, #tpu.memory_space<vmem>>, %arg10: memref<8x20x4xf32, #tpu.memory_space<vmem>>, %arg11: memref<64x36xf32, #tpu.memory_space<vmem>>) attributes {dimension_semantics = [#tpu.dimension_semantics<parallel>, #tpu.dimension_semantics<parallel>], iteration_bounds = array<i64: 2, 4>, scalar_prefetch = 0 : i64, scratch_operands = 2 : i64, tpu.core_type = #tpu.core_type<tc>, window_params = [{transform_indices = @transform_0, window_bounds = array<i64: 1, 4, 16, 4>}, {transform_indices = @transform_1, window_bounds = array<i64: 1, 2, 16, 4>}, {transform_indices = @transform_2, window_bounds = array<i64: 1, 2, 16, 4>}, {pipeline_mode = #tpu.pipeline_mode<synchronous>, transform_indices = @transform_3, window_bounds = array<i64: 36, 4>}, {pipeline_mode = #tpu.pipeline_mode<synchronous>, transform_indices = @transform_4, window_bounds = array<i64: 1, 4>}, {pipeline_mode = #tpu.pipeline_mode<synchronous>, transform_indices = @transform_5, window_bounds = array<i64: 4, 4>}, {pipeline_mode = #tpu.pipeline_mode<synchronous>, transform_indices = @transform_6, window_bounds = array<i64: 1, 4>}, {transform_indices = @transform_7, window_bounds = array<i64: 1, 4, 16, 4>}]} {
    %cst = arith.constant 0.000000e+00 : f32
    %0 = vector.broadcast %cst : f32 to vector<8x2x4xf32>
    %c0 = arith.constant 0 : index
    %c0_0 = arith.constant 0 : index
    %c0_1 = arith.constant 0 : index
    %1 = vector.load %arg10[%c0, %c0_0, %c0_1] : memref<8x20x4xf32, #tpu.memory_space<vmem>>, vector<8x2x4xf32>
    tpu.vector_store %arg10[%c0, %c0_0, %c0_1], %0 {strides = array<i32>} : memref<8x20x4xf32, #tpu.memory_space<vmem>>, vector<8x2x4xf32>,
    %cst_2 = arith.constant 0.000000e+00 : f32
    %2 = vector.broadcast %cst_2 : f32 to vector<8x2x4xf32>
    %c0_3 = arith.constant 0 : index
    %c18 = arith.constant 18 : index
    %c0_4 = arith.constant 0 : index
    %3 = vector.load %arg10[%c0_3, %c18, %c0_4] : memref<8x20x4xf32, #tpu.memory_space<vmem>>, vector<8x2x4xf32>
    tpu.vector_store %arg10[%c0_3, %c18, %c0_4], %2 {strides = array<i32>} : memref<8x20x4xf32, #tpu.memory_space<vmem>>, vector<8x2x4xf32>,
    %c0_i32 = arith.constant 0 : i32
    %4 = arith.cmpi eq, %arg1, %c0_i32 : i32
    %5 = arith.extui %4 : i1 to i32
    %c0_i32_5 = arith.constant 0 : i32
    %6 = arith.cmpi ne, %5, %c0_i32_5 : i32
    scf.if %6 {
      %cst_75 = arith.constant 0.000000e+00 : f32
      %70 = vector.broadcast %cst_75 : f32 to vector<2x16x4xf32>
      %c0_76 = arith.constant 0 : index
      %c2_77 = arith.constant 2 : index
      %c0_78 = arith.constant 0 : index
      %71 = vector.load %arg10[%c0_76, %c2_77, %c0_78] : memref<8x20x4xf32, #tpu.memory_space<vmem>>, vector<2x16x4xf32>
      tpu.vector_store %arg10[%c0_76, %c2_77, %c0_78], %70 {strides = array<i32>} : memref<8x20x4xf32, #tpu.memory_space<vmem>>, vector<2x16x4xf32>,
    } else {
    }
    %c0_i32_6 = arith.constant 0 : i32
    %7 = arith.cmpi sgt, %arg1, %c0_i32_6 : i32
    %8 = arith.extui %7 : i1 to i32
    %c0_i32_7 = arith.constant 0 : i32
    %9 = arith.cmpi ne, %8, %c0_i32_7 : i32
    scf.if %9 {
      %c0_75 = arith.constant 0 : index
      %c0_76 = arith.constant 0 : index
      %c0_77 = arith.constant 0 : index
      %c0_78 = arith.constant 0 : index
      %70 = vector.load %arg3[%c0_75, %c0_76, %c0_77, %c0_78] : memref<1x2x16x4xf32, #tpu.memory_space<vmem>>, vector<1x2x16x4xf32>
      %71 = vector.shape_cast %70 : vector<1x2x16x4xf32> to vector<2x16x4xf32>
      %c0_79 = arith.constant 0 : index
      %c2_80 = arith.constant 2 : index
      %c0_81 = arith.constant 0 : index
      %72 = vector.load %arg10[%c0_79, %c2_80, %c0_81] : memref<8x20x4xf32, #tpu.memory_space<vmem>>, vector<2x16x4xf32>
      tpu.vector_store %arg10[%c0_79, %c2_80, %c0_81], %71 {strides = array<i32>} : memref<8x20x4xf32, #tpu.memory_space<vmem>>, vector<2x16x4xf32>,
    } else {
    }
    %c3_i32 = arith.constant 3 : i32
    %10 = arith.cmpi eq, %arg1, %c3_i32 : i32
    %11 = arith.extui %10 : i1 to i32
    %c0_i32_8 = arith.constant 0 : i32
    %12 = arith.cmpi ne, %11, %c0_i32_8 : i32
    scf.if %12 {
      %cst_75 = arith.constant 0.000000e+00 : f32
      %70 = vector.broadcast %cst_75 : f32 to vector<2x16x4xf32>
      %c6 = arith.constant 6 : index
      %c2_76 = arith.constant 2 : index
      %c0_77 = arith.constant 0 : index
      %71 = vector.load %arg10[%c6, %c2_76, %c0_77] : memref<8x20x4xf32, #tpu.memory_space<vmem>>, vector<2x16x4xf32>
      tpu.vector_store %arg10[%c6, %c2_76, %c0_77], %70 {strides = array<i32>} : memref<8x20x4xf32, #tpu.memory_space<vmem>>, vector<2x16x4xf32>,
    } else {
    }
    %c3_i32_9 = arith.constant 3 : i32
    %13 = arith.cmpi slt, %arg1, %c3_i32_9 : i32
    %14 = arith.extui %13 : i1 to i32
    %c0_i32_10 = arith.constant 0 : i32
    %15 = arith.cmpi ne, %14, %c0_i32_10 : i32
    scf.if %15 {
      %c0_75 = arith.constant 0 : index
      %c0_76 = arith.constant 0 : index
      %c0_77 = arith.constant 0 : index
      %c0_78 = arith.constant 0 : index
      %70 = vector.load %arg4[%c0_75, %c0_76, %c0_77, %c0_78] : memref<1x2x16x4xf32, #tpu.memory_space<vmem>>, vector<1x2x16x4xf32>
      %71 = vector.shape_cast %70 : vector<1x2x16x4xf32> to vector<2x16x4xf32>
      %c6 = arith.constant 6 : index
      %c2_79 = arith.constant 2 : index
      %c0_80 = arith.constant 0 : index
      %72 = vector.load %arg10[%c6, %c2_79, %c0_80] : memref<8x20x4xf32, #tpu.memory_space<vmem>>, vector<2x16x4xf32>
      tpu.vector_store %arg10[%c6, %c2_79, %c0_80], %71 {strides = array<i32>} : memref<8x20x4xf32, #tpu.memory_space<vmem>>, vector<2x16x4xf32>,
    } else {
    }
    %c0_11 = arith.constant 0 : index
    %c0_12 = arith.constant 0 : index
    %c0_13 = arith.constant 0 : index
    %c0_14 = arith.constant 0 : index
    %16 = vector.load %arg2[%c0_11, %c0_12, %c0_13, %c0_14] : memref<1x4x16x4xf32, #tpu.memory_space<vmem>>, vector<1x4x16x4xf32>
    %17 = vector.shape_cast %16 : vector<1x4x16x4xf32> to vector<4x16x4xf32>
    %c2 = arith.constant 2 : index
    %c2_15 = arith.constant 2 : index
    %c0_16 = arith.constant 0 : index
    %18 = vector.load %arg10[%c2, %c2_15, %c0_16] : memref<8x20x4xf32, #tpu.memory_space<vmem>>, vector<4x16x4xf32>
    tpu.vector_store %arg10[%c2, %c2_15, %c0_16], %17 {strides = array<i32>} : memref<8x20x4xf32, #tpu.memory_space<vmem>>, vector<4x16x4xf32>,
    %c0_17 = arith.constant 0 : index
    %c0_18 = arith.constant 0 : index
    %c0_19 = arith.constant 0 : index
    %19 = vector.load %arg10[%c0_17, %c0_18, %c0_19] : memref<8x20x4xf32, #tpu.memory_space<vmem>>, vector<4x16x4xf32>
    %20 = vector.shape_cast %19 : vector<4x16x4xf32> to vector<64x4xf32>
    %c0_20 = arith.constant 0 : index
    %c0_21 = arith.constant 0 : index
    %21 = vector.load %arg11[%c0_20, %c0_21] : memref<64x36xf32, #tpu.memory_space<vmem>>, vector<64x4xf32>
    tpu.vector_store %arg11[%c0_20, %c0_21], %20 {strides = array<i32>} : memref<64x36xf32, #tpu.memory_space<vmem>>, vector<64x4xf32>,
    %c0_22 = arith.constant 0 : index
    %c2_23 = arith.constant 2 : index
    %c0_24 = arith.constant 0 : index
    %22 = vector.load %arg10[%c0_22, %c2_23, %c0_24] : memref<8x20x4xf32, #tpu.memory_space<vmem>>, vector<4x16x4xf32>
    %23 = vector.shape_cast %22 : vector<4x16x4xf32> to vector<64x4xf32>
    %c0_25 = arith.constant 0 : index
    %c4 = arith.constant 4 : index
    %24 = vector.load %arg11[%c0_25, %c4] : memref<64x36xf32, #tpu.memory_space<vmem>>, vector<64x4xf32>
    tpu.vector_store %arg11[%c0_25, %c4], %23 {strides = array<i32>} : memref<64x36xf32, #tpu.memory_space<vmem>>, vector<64x4xf32>,
    %c0_26 = arith.constant 0 : index
    %c4_27 = arith.constant 4 : index
    %c0_28 = arith.constant 0 : index
    %25 = vector.load %arg10[%c0_26, %c4_27, %c0_28] : memref<8x20x4xf32, #tpu.memory_space<vmem>>, vector<4x16x4xf32>
    %26 = vector.shape_cast %25 : vector<4x16x4xf32> to vector<64x4xf32>
    %c0_29 = arith.constant 0 : index
    %c8 = arith.constant 8 : index
    %27 = vector.load %arg11[%c0_29, %c8] : memref<64x36xf32, #tpu.memory_space<vmem>>, vector<64x4xf32>
    tpu.vector_store %arg11[%c0_29, %c8], %26 {strides = array<i32>} : memref<64x36xf32, #tpu.memory_space<vmem>>, vector<64x4xf32>,
    %c2_30 = arith.constant 2 : index
    %c0_31 = arith.constant 0 : index
    %c0_32 = arith.constant 0 : index
    %28 = vector.load %arg10[%c2_30, %c0_31, %c0_32] : memref<8x20x4xf32, #tpu.memory_space<vmem>>, vector<4x16x4xf32>
    %29 = vector.shape_cast %28 : vector<4x16x4xf32> to vector<64x4xf32>
    %c0_33 = arith.constant 0 : index
    %c12 = arith.constant 12 : index
    %30 = vector.load %arg11[%c0_33, %c12] : memref<64x36xf32, #tpu.memory_space<vmem>>, vector<64x4xf32>
    tpu.vector_store %arg11[%c0_33, %c12], %29 {strides = array<i32>} : memref<64x36xf32, #tpu.memory_space<vmem>>, vector<64x4xf32>,
    %c2_34 = arith.constant 2 : index
    %c2_35 = arith.constant 2 : index
    %c0_36 = arith.constant 0 : index
    %31 = vector.load %arg10[%c2_34, %c2_35, %c0_36] : memref<8x20x4xf32, #tpu.memory_space<vmem>>, vector<4x16x4xf32>
    %32 = vector.shape_cast %31 : vector<4x16x4xf32> to vector<64x4xf32>
    %c0_37 = arith.constant 0 : index
    %c16 = arith.constant 16 : index
    %33 = vector.load %arg11[%c0_37, %c16] : memref<64x36xf32, #tpu.memory_space<vmem>>, vector<64x4xf32>
    tpu.vector_store %arg11[%c0_37, %c16], %32 {strides = array<i32>} : memref<64x36xf32, #tpu.memory_space<vmem>>, vector<64x4xf32>,
    %c2_38 = arith.constant 2 : index
    %c4_39 = arith.constant 4 : index
    %c0_40 = arith.constant 0 : index
    %34 = vector.load %arg10[%c2_38, %c4_39, %c0_40] : memref<8x20x4xf32, #tpu.memory_space<vmem>>, vector<4x16x4xf32>
    %35 = vector.shape_cast %34 : vector<4x16x4xf32> to vector<64x4xf32>
    %c0_41 = arith.constant 0 : index
    %c20 = arith.constant 20 : index
    %36 = vector.load %arg11[%c0_41, %c20] : memref<64x36xf32, #tpu.memory_space<vmem>>, vector<64x4xf32>
    tpu.vector_store %arg11[%c0_41, %c20], %35 {strides = array<i32>} : memref<64x36xf32, #tpu.memory_space<vmem>>, vector<64x4xf32>,
    %c4_42 = arith.constant 4 : index
    %c0_43 = arith.constant 0 : index
    %c0_44 = arith.constant 0 : index
    %37 = vector.load %arg10[%c4_42, %c0_43, %c0_44] : memref<8x20x4xf32, #tpu.memory_space<vmem>>, vector<4x16x4xf32>
    %38 = vector.shape_cast %37 : vector<4x16x4xf32> to vector<64x4xf32>
    %c0_45 = arith.constant 0 : index
    %c24 = arith.constant 24 : index
    %39 = vector.load %arg11[%c0_45, %c24] : memref<64x36xf32, #tpu.memory_space<vmem>>, vector<64x4xf32>
    tpu.vector_store %arg11[%c0_45, %c24], %38 {strides = array<i32>} : memref<64x36xf32, #tpu.memory_space<vmem>>, vector<64x4xf32>,
    %c4_46 = arith.constant 4 : index
    %c2_47 = arith.constant 2 : index
    %c0_48 = arith.constant 0 : index
    %40 = vector.load %arg10[%c4_46, %c2_47, %c0_48] : memref<8x20x4xf32, #tpu.memory_space<vmem>>, vector<4x16x4xf32>
    %41 = vector.shape_cast %40 : vector<4x16x4xf32> to vector<64x4xf32>
    %c0_49 = arith.constant 0 : index
    %c28 = arith.constant 28 : index
    %42 = vector.load %arg11[%c0_49, %c28] : memref<64x36xf32, #tpu.memory_space<vmem>>, vector<64x4xf32>
    tpu.vector_store %arg11[%c0_49, %c28], %41 {strides = array<i32>} : memref<64x36xf32, #tpu.memory_space<vmem>>, vector<64x4xf32>,
    %c4_50 = arith.constant 4 : index
    %c4_51 = arith.constant 4 : index
    %c0_52 = arith.constant 0 : index
    %43 = vector.load %arg10[%c4_50, %c4_51, %c0_52] : memref<8x20x4xf32, #tpu.memory_space<vmem>>, vector<4x16x4xf32>
    %44 = vector.shape_cast %43 : vector<4x16x4xf32> to vector<64x4xf32>
    %c0_53 = arith.constant 0 : index
    %c32 = arith.constant 32 : index
    %45 = vector.load %arg11[%c0_53, %c32] : memref<64x36xf32, #tpu.memory_space<vmem>>, vector<64x4xf32>
    tpu.vector_store %arg11[%c0_53, %c32], %44 {strides = array<i32>} : memref<64x36xf32, #tpu.memory_space<vmem>>, vector<64x4xf32>,
    %c0_54 = arith.constant 0 : index
    %c0_55 = arith.constant 0 : index
    %46 = vector.load %arg11[%c0_54, %c0_55] : memref<64x36xf32, #tpu.memory_space<vmem>>, vector<64x36xf32>
    %c0_56 = arith.constant 0 : index
    %c0_57 = arith.constant 0 : index
    %47 = vector.load %arg5[%c0_56, %c0_57] : memref<36x4xf32, #tpu.memory_space<vmem>>, vector<36x4xf32>
    %cst_58 = arith.constant dense<0.000000e+00> : vector<64x4xf32>
    %48 = tpu.matmul %46, %47, %cst_58 {dimension_numbers = #tpu.dot_dimension_numbers<[1], [0], [0], [1], [0, 0, 1, 1], [], []>} : vector<64x36xf32>, vector<36x4xf32>, vector<64x4xf32> -> vector<64x4xf32>
    %c0_59 = arith.constant 0 : index
    %c0_60 = arith.constant 0 : index
    %49 = vector.load %arg6[%c0_59, %c0_60] : memref<1x4xf32, #tpu.memory_space<vmem>>, vector<1x4xf32>
    %50 = vector.shape_cast %49 : vector<1x4xf32> to vector<4xf32>
    %51 = vector.shape_cast %50 : vector<4xf32> to vector<1x4xf32>
    %52 = vector.broadcast %51 : vector<1x4xf32> to vector<64x4xf32>
    %53 = arith.addf %48, %52 : vector<64x4xf32>
    %cst_61 = arith.constant 0.000000e+00 : f32
    %54 = vector.broadcast %cst_61 : f32 to vector<64x4xf32>
    %55 = arith.maximumf %53, %54 : vector<64x4xf32>
    %c0_62 = arith.constant 0 : index
    %c0_63 = arith.constant 0 : index
    %56 = vector.load %arg7[%c0_62, %c0_63] : memref<4x4xf32, #tpu.memory_space<vmem>>, vector<4x4xf32>
    %cst_64 = arith.constant dense<0.000000e+00> : vector<64x4xf32>
    %57 = tpu.matmul %55, %56, %cst_64 {dimension_numbers = #tpu.dot_dimension_numbers<[1], [0], [0], [1], [0, 0, 1, 1], [], []>} : vector<64x4xf32>, vector<4x4xf32>, vector<64x4xf32> -> vector<64x4xf32>
    %c0_65 = arith.constant 0 : index
    %c0_66 = arith.constant 0 : index
    %58 = vector.load %arg8[%c0_65, %c0_66] : memref<1x4xf32, #tpu.memory_space<vmem>>, vector<1x4xf32>
    %59 = vector.shape_cast %58 : vector<1x4xf32> to vector<4xf32>
    %60 = vector.shape_cast %59 : vector<4xf32> to vector<1x4xf32>
    %61 = vector.broadcast %60 : vector<1x4xf32> to vector<64x4xf32>
    %62 = arith.addf %57, %61 : vector<64x4xf32>
    %c0_67 = arith.constant 0 : index
    %c0_68 = arith.constant 0 : index
    %c0_69 = arith.constant 0 : index
    %c0_70 = arith.constant 0 : index
    %63 = vector.load %arg2[%c0_67, %c0_68, %c0_69, %c0_70] : memref<1x4x16x4xf32, #tpu.memory_space<vmem>>, vector<1x4x16x4xf32>
    %64 = vector.shape_cast %63 : vector<1x4x16x4xf32> to vector<4x16x4xf32>
    %65 = vector.shape_cast %62 : vector<64x4xf32> to vector<4x16x4xf32>
    %66 = arith.addf %64, %65 : vector<4x16x4xf32>
    %c0_71 = arith.constant 0 : index
    %c0_72 = arith.constant 0 : index
    %c0_73 = arith.constant 0 : index
    %c0_74 = arith.constant 0 : index
    %67 = vector.load %arg9[%c0_71, %c0_72, %c0_73, %c0_74] : memref<1x4x16x4xf32, #tpu.memory_space<vmem>>, vector<1x4x16x4xf32>
    %68 = vector.shape_cast %67 : vector<1x4x16x4xf32> to vector<4x16x4xf32>
    %69 = vector.shape_cast %66 : vector<4x16x4xf32> to vector<1x4x16x4xf32>
    tpu.vector_store %arg9[%c0_71, %c0_72, %c0_73, %c0_74], %69 {strides = array<i32>} : memref<1x4x16x4xf32, #tpu.memory_space<vmem>>, vector<1x4x16x4xf32>,
    return
  }
  func.func @transform_0(%arg0: i32, %arg1: i32) -> (i32, i32, i32, i32) {
    %c0_i32 = arith.constant 0 : i32
    %c0_i32_0 = arith.constant 0 : i32
    %c0_i32_1 = arith.constant 0 : i32
    return %arg0, %arg1, %c0_i32, %c0_i32_0 : i32, i32, i32, i32
  }
  func.func @transform_1(%arg0: i32, %arg1: i32) -> (i32, i32, i32, i32) {
    %c2_i32 = arith.constant 2 : i32
    %0 = arith.muli %arg1, %c2_i32 : i32
    %c1_i32 = arith.constant 1 : i32
    %1 = arith.subi %0, %c1_i32 : i32
    %c0_i32 = arith.constant 0 : i32
    %2 = arith.maxsi %1, %c0_i32 : i32
    %c0_i32_0 = arith.constant 0 : i32
    %c0_i32_1 = arith.constant 0 : i32
    %c0_i32_2 = arith.constant 0 : i32
    return %arg0, %2, %c0_i32_0, %c0_i32_1 : i32, i32, i32, i32
  }
  func.func @transform_2(%arg0: i32, %arg1: i32) -> (i32, i32, i32, i32) {
    %c1_i32 = arith.constant 1 : i32
    %0 = arith.addi %arg1, %c1_i32 : i32
    %c2_i32 = arith.constant 2 : i32
    %1 = arith.muli %0, %c2_i32 : i32
    %c7_i32 = arith.constant 7 : i32
    %2 = arith.minsi %1, %c7_i32 : i32
    %c0_i32 = arith.constant 0 : i32
    %c0_i32_0 = arith.constant 0 : i32
    %c0_i32_1 = arith.constant 0 : i32
    return %arg0, %2, %c0_i32, %c0_i32_0 : i32, i32, i32, i32
  }
  func.func @transform_3(%arg0: i32, %arg1: i32) -> (i32, i32) {
    %c0_i32 = arith.constant 0 : i32
    %c0_i32_0 = arith.constant 0 : i32
    %c0_i32_1 = arith.constant 0 : i32
    return %c0_i32, %c0_i32_0 : i32, i32
  }
  func.func @transform_4(%arg0: i32, %arg1: i32) -> (i32, i32) {
    %c0_i32 = arith.constant 0 : i32
    %c0_i32_0 = arith.constant 0 : i32
    %c0_i32_1 = arith.constant 0 : i32
    return %c0_i32, %c0_i32_0 : i32, i32
  }
  func.func @transform_5(%arg0: i32, %arg1: i32) -> (i32, i32) {
    %c0_i32 = arith.constant 0 : i32
    %c0_i32_0 = arith.constant 0 : i32
    %c0_i32_1 = arith.constant 0 : i32
    return %c0_i32, %c0_i32_0 : i32, i32
  }
  func.func @transform_6(%arg0: i32, %arg1: i32) -> (i32, i32) {
    %c0_i32 = arith.constant 0 : i32
    %c0_i32_0 = arith.constant 0 : i32
    %c0_i32_1 = arith.constant 0 : i32
    return %c0_i32, %c0_i32_0 : i32, i32
  }
  func.func @transform_7(%arg0: i32, %arg1: i32) -> (i32, i32, i32, i32) {
    %c0_i32 = arith.constant 0 : i32
    %c0_i32_0 = arith.constant 0 : i32
    %c0_i32_1 = arith.constant 0 : i32
    return %arg0, %arg1, %c0_i32, %c0_i32_0 : i32, i32, i32, i32
  }
}

</mosaic_0001>

<bundles_post_ra>
// kernel: dcl_forward_nchw.1
= control target key start
LH: loop header
LB: loop body
LE: loop exit
PB: predicated region body
PF: predicated region fallthrough
CT: control target
= control target key end

     0   :  { %s1676_s24 = smov 0   ;;  %s1678_s25 = smov 0   ;;  %s2023_s0 = inlined_call_operand.vmem [shape: f32[2,16,16,4], index: 0, kind: input, shape index: {}, may-alias: {0,1,2}]   ;;  %s2024_s1 = inlined_call_operand.vmem [shape: f32[2,16,16,4], index: 1, kind: input, shape index: {}, may-alias: {0,1,2}]   ;;  %s2025_s2 = inlined_call_operand.vmem [shape: f32[2,16,16,4], index: 2, kind: input, shape index: {}, may-alias: {0,1,2}]   ;;  %s2026_s3 = inlined_call_operand.vmem [shape: f32[36,4], index: 3, kind: input, shape index: {}]   ;;  %s2027_s4 = inlined_call_operand.vmem [shape: f32[1,4], index: 4, kind: input, shape index: {}]   ;;  %s2028_s5 = inlined_call_operand.vmem [shape: f32[4,4], index: 5, kind: input, shape index: {}]   ;;  %s2029_s6 = inlined_call_operand.vmem [shape: f32[1,4], index: 6, kind: input, shape index: {}]   ;;  %s2030_s7 = inlined_call_operand.vmem [shape: f32[2,16,16,4], index: 7, kind: output, shape index: {}]  }
   0x1   :  { %2031 = sst [smem:[#allocation4_spill]] %s2023_s0  ;;  %s1680_s26 = smov 0  }
   0x2   :  { %2032 = sst [smem:[#allocation5_spill]] %s2030_s7  ;;  %s1682_s27 = smov 0  }
   0x3   :  { %s1684_s28 = smov 0  }
   0x4 LB: > { %s26_s29 = sadd.s32 1, %s1615_s26  ;;  %s29_s30 = sadd.s32 1, %s1619_s27  ;;  %s1623_s28 = sphi %s1684_s28, %s17_s28   ;;  %s1619_s27 = sphi %s1682_s27, %s2039_s27   ;;  %s1615_s26 = sphi %s1680_s26, %s2038_s26   ;;  %s1611_s25 = sphi %s1678_s25, %s2037_s25   ;;  %s1607_s24 = sphi %s1676_s24, %s2036_s24  }
   0x5   : > { %p27_p0 = scmp.ge.s32.totalorder %s26_s29, 4  ;;  %p1424_p1 = scmp.ge.s32.totalorder %s1623_s28, 1 }
   0x6   : > { %p327_p2 = scmp.lt.s32.totalorder %s1623_s28, 9 }
   0x7   : > { %s2041_s29 = smov (%p27_p0, %s26_s29), 0  ;;  %s2043_s30 = smov (!%p27_p0, %s29_s30), %s1619_s27 }
   0x8   : > { %p328_p3 = pnand %p1424_p1, %p327_p2  ;;  %p31_p4 = scmp.ge.s32.totalorder %s2043_s30, 2 }
   0x9   : > { %s1425_s8 = sshll.u32 (!%p328_p3), %s1607_s24, 2  ;;  %p398_p5 = scmp.lt.s32.totalorder (!%p328_p3), %s1611_s25, 1 }
   0xa   : > { %s2045_s30 = smov (%p31_p4, %s2043_s30), 0  ;;  %331 = sbr.rel (%p328_p3) target bundleno = 716 (0x2cc), region = 48 }
   0xb   : > { %p1712_p6 = scmp.lt.s32.totalorder (!%p328_p3), %s1425_s8, 15  ;;  %s1429_s10 = sshll.u32 (!%p328_p3), %s1607_s24, 1 }
   0xc   : > { %s1430_s12 = sadd.s32 (!%p328_p3), 4294967295, %s1429_s10  ;;  %s1475_s15 = sadd.s32 (!%p328_p3), 2, %s1429_s10 }
   0xd   : > { %p410_p7 = scmp.gt.s32.totalorder (!%p328_p3), %s1430_s12, 0  ;;  %p429_p8 = scmp.lt.s32.totalorder (!%p328_p3), %s1475_s15, 7 }
   0xe   : > { %s2034_s0 = sld [smem:[#allocation4_spill]] (!%p328_p3)  ;;  %p1444_p11 = scmp.ne.s32.totalorder (!%p328_p3), %s1607_s24, 0 }
   0xf   : > { %vm457_vm0 = vcmask 25600   ;;  %v1625_v0 = vmov 0.0   ;;  %s2047_s25 = smov (!%p398_p5, %s1611_s25), 1  ;;  %s2049_s8 = smov (!%p1712_p6, %s1425_s8), 15 }
  0x10   : > { %458 = vst.msk [vmem:[#allocation2] sm:$0x3] %vm457_vm0, %v1625_v0  ;;  %459 = vst.msk [vmem:[#allocation2 + $0x18] sm:$0x3] %vm457_vm0, %v1625_v0  ;;  %s1427_s11 = sshll.u32 %s2047_s25, 5  ;;  %s1426_s13 = sshll.u32 %s2049_s8, 1 }
  0x11   : > { %460 = vst.msk [vmem:[#allocation2 + $0x30] sm:$0x3] %vm457_vm0, %v1625_v0  ;;  %461 = vst.msk [vmem:[#allocation2 + $0x48] sm:$0x3] %vm457_vm0, %v1625_v0  ;;  %s404_s14 = sadd.s32 %s1427_s11, %s1426_s13  ;;  %s2035_s7 = sld [smem:[#allocation5_spill]] }
  0x12   : > { %462 = vst.msk [vmem:[#allocation2 + $0x60] sm:$0x3] %vm457_vm0, %v1625_v0  ;;  %463 = vst.msk [vmem:[#allocation2 + $0x78] sm:$0x3] %vm457_vm0, %v1625_v0  ;;  %s1428_s16 = sshll.u32 %s404_s14, 3  ;;  %s2051_s12 = smov (!%p410_p7, %s1430_s12), 0 }
  0x13   : > { %464 = vst.msk [vmem:[#allocation2 + $0x90] sm:$0x3] %vm457_vm0, %v1625_v0  ;;  %465 = vst.msk [vmem:[#allocation2 + $0xa8] sm:$0x3] %vm457_vm0, %v1625_v0  ;;  %s2053_s15 = smov (!%p429_p8, %s1475_s15), 7  ;;  %s1431_s23 = sshll.u32 %s2051_s12, 1 }
  0x14   : > { %466 = vst.msk [vmem:[#allocation2 + $0x12] sm:$0x3] %vm457_vm0, %v1625_v0  ;;  %467 = vst.msk [vmem:[#allocation2 + $0x2a] sm:$0x3] %vm457_vm0, %v1625_v0  ;;  %s1741_s19 = scalar_lea.vmem %s2034_s0, %s1428_s16  ;;  %p415_p9 = scmp.lt.s32.totalorder %s1431_s23, 15 }
  0x15   : > { %468 = vst.msk [vmem:[#allocation2 + $0x42] sm:$0x3] %vm457_vm0, %v1625_v0  ;;  %469 = vst.msk [vmem:[#allocation2 + $0x5a] sm:$0x3] %vm457_vm0, %v1625_v0  ;;  %s1436_s25 = sshll.u32 %s2053_s15, 1 }
  0x16   : > { %470 = vst.msk [vmem:[#allocation2 + $0x72] sm:$0x3] %vm457_vm0, %v1625_v0  ;;  %471 = vst.msk [vmem:[#allocation2 + $0x8a] sm:$0x3] %vm457_vm0, %v1625_v0  ;;  %p434_p10 = scmp.lt.s32.totalorder %s1436_s25, 15  ;;  %s2055_s23 = smov (!%p415_p9, %s1431_s23), 15 }
  0x17   : > { %472 = vst.msk [vmem:[#allocation2 + $0xa2] sm:$0x3] %vm457_vm0, %v1625_v0  ;;  %473 = vst.msk [vmem:[#allocation2 + $0xba] sm:$0x3] %vm457_vm0, %v1625_v0  ;;  %s1746_s22 = scalar_lea.vmem %s2035_s7, %s1428_s16  ;;  %s1432_s8 = sshll.u32 %s2055_s23, 1 }
  0x18   : > { %s2057_s25 = smov (!%p434_p10, %s1436_s25), 15  ;;  %s419_s9 = sadd.s32 %s1432_s8, %s1427_s11 }
  0x19   : > { %s1437_s10 = sshll.u32 %s2057_s25, 1  ;;  %s1434_s13 = sshll.u32 %s419_s9, 3 }
  0x1a   : > { %s438_s14 = sadd.s32 %s1437_s10, %s1427_s11  ;;  %s421_s0 = scalar_lea.vmem %s2024_s1, %s1434_s13 }
  0x1b   : > { %s1439_s20 = sshll.u32 %s438_s14, 3  ;;  %477 = sbr.rel (%p1444_p11) target bundleno = 35 (0x23), region = 52 }
  0x1c   : > { %s1754_s7 = scalar_lea.vmem %s2025_s2, %s1439_s20 }
  0x20   : > { %vm478_vm1 = vcmask 31744   ;;  %v1626_v1 = vmov 0.0  }
  0x21   : > { %479 = vst.msk [vmem:[#allocation2 + $0x2] sm:$0xff] %vm478_vm1, %v1626_v1  ;;  %480 = vst.msk [vmem:[#allocation2 + $0xa] sm:$0xff] %vm478_vm1, %v1626_v1 }
  0x22   : > { %481 = vst.msk [vmem:[#allocation2 + $0x1a] sm:$0xff] %vm478_vm1, %v1626_v1  ;;  %482 = vst.msk [vmem:[#allocation2 + $0x22] sm:$0xff] %vm478_vm1, %v1626_v1 }
  0x23 PF: > { %p1445_p12 = scmp.le.s32.totalorder %s1607_s24, 0 }
  0x25   : > { %486 = sbr.rel (%p1445_p12) target bundleno = 45 (0x2d), region = 56 }
  0x2a   : > { %v487_v2 = vld [vmem:[%s421_s0] sm:$0xff]  ;;  %vm491_vm2 = vcmask 31744   ;;  %v488_v3 = vld [vmem:[%s421_s0 + $0x8] sm:$0xff]  ;;  %v489_v4 = vld [vmem:[%s421_s0 + $0x10] sm:$0xff] }
  0x2b   : > { %492 = vst.msk [vmem:[#allocation2 + $0x2] sm:$0xff] %vm491_vm2, %v487_v2  ;;  %493 = vst.msk [vmem:[#allocation2 + $0xa] sm:$0xff] %vm491_vm2, %v488_v3  ;;  %v490_v5 = vld [vmem:[%s421_s0 + $0x18] sm:$0xff] }
  0x2c   : > { %494 = vst.msk [vmem:[#allocation2 + $0x1a] sm:$0xff] %vm491_vm2, %v489_v4  ;;  %495 = vst.msk [vmem:[#allocation2 + $0x22] sm:$0xff] %vm491_vm2, %v490_v5 }
  0x2d PF: > { %p1446_p13 = scmp.ne.s32.totalorder %s1607_s24, 3 }
  0x2f   : > { %499 = sbr.rel (%p1446_p13) target bundleno = 55 (0x37), region = 60 }
  0x34   : > { %vm501_vm3 = vcmask 31744   ;;  %v1627_v6 = vmov 0.0  }
  0x35   : > { %502 = vst.msk [vmem:[#allocation2 + $0x92] sm:$0xff] %vm501_vm3, %v1627_v6  ;;  %503 = vst.msk [vmem:[#allocation2 + $0x9a] sm:$0xff] %vm501_vm3, %v1627_v6 }
  0x36   : > { %504 = vst.msk [vmem:[#allocation2 + $0xaa] sm:$0xff] %vm501_vm3, %v1627_v6  ;;  %505 = vst.msk [vmem:[#allocation2 + $0xb2] sm:$0xff] %vm501_vm3, %v1627_v6 }
  0x37 PF: > { %p1447_p0 = scmp.ge.s32.totalorder %s1607_s24, 3 }
  0x39   : > { %509 = sbr.rel (%p1447_p0) target bundleno = 65 (0x41), region = 64 }
  0x3e   : > { %v510_v7 = vld [vmem:[%s1754_s7] sm:$0xff]  ;;  %vm515_vm4 = vcmask 31744   ;;  %v511_v8 = vld [vmem:[%s1754_s7 + $0x8] sm:$0xff]  ;;  %v512_v9 = vld [vmem:[%s1754_s7 + $0x10] sm:$0xff] }
  0x3f   : > { %516 = vst.msk [vmem:[#allocation2 + $0x92] sm:$0xff] %vm515_vm4, %v510_v7  ;;  %517 = vst.msk [vmem:[#allocation2 + $0x9a] sm:$0xff] %vm515_vm4, %v511_v8  ;;  %v513_v10 = vld [vmem:[%s1754_s7 + $0x18] sm:$0xff] }
  0x40   : > { %518 = vst.msk [vmem:[#allocation2 + $0xaa] sm:$0xff] %vm515_vm4, %v512_v9  ;;  %519 = vst.msk [vmem:[#allocation2 + $0xb2] sm:$0xff] %vm515_vm4, %v513_v10 }
  0x41 PF: > { %v603_v11 = vld [vmem:[#allocation2 + $0x4] sm:$0xff]  ;;  %vm529_vm5 = vcmask 31744   ;;  %s1628_s0 = smov 8   ;;  %s1629_s24 = smov 4   ;;  %v604_v15 = vld [vmem:[#allocation2 + $0xc] sm:$0xff]  ;;  %v1790_v20 = vld [vmem:[%s1741_s19 + $0x18] sm:$0xff] }
  0x42   : > { %v554_v12 = vld [vmem:[#allocation2 + $0x2] sm:$0xff]  ;;  %619 = vrot.lane.b32.xlu1 %v603_v11, %s1628_s0  ;;  %v555_v16 = vld [vmem:[#allocation2 + $0xa] sm:$0xff]  ;;  %533 = vst.msk [vmem:[#allocation2 + $0x52] sm:$0xff] %vm529_vm5, %v1790_v20  ;;  %v1804_v22 = vld [vmem:[%s1741_s19 + $0x38] sm:$0xff]  ;;  %s1630_s7 = smov 12   ;;  %s1631_s11 = smov 16  }
  0x43   : > { %570 = vrot.lane.b32.xlu0 %v554_v12, %s1629_s24  ;;  %v1767_v13 = vld [vmem:[%s1741_s19] sm:$0xff]  ;;  %v1770_v14 = vld [vmem:[%s1741_s19 + $0x8] sm:$0xff]  ;;  %v1780_v18 = vld [vmem:[%s1741_s19 + $0x10] sm:$0xff]  ;;  %537 = vst.msk [vmem:[#allocation2 + $0x82] sm:$0xff] %vm529_vm5, %v1804_v22  ;;  %s1632_s12 = smov 20   ;;  %s1633_s15 = smov 24  }
  0x44   : > { %530 = vst.msk [vmem:[#allocation2 + $0x32] sm:$0xff] %vm529_vm5, %v1767_v13  ;;  %531 = vst.msk [vmem:[#allocation2 + $0x3a] sm:$0xff] %vm529_vm5, %v1770_v14  ;;  %v1777_v17 = vld [vmem:[%s1741_s19 + $0x20] sm:$0xff]  ;;  %v1787_v19 = vld [vmem:[%s1741_s19 + $0x28] sm:$0xff]  ;;  %vm992_vm6 = vcmask 1043456   ;;  %s1634_s25 = smov 28  }
  0x45   : > { %534 = vst.msk [vmem:[#allocation2 + $0x62] sm:$0xff] %vm529_vm5, %v1777_v17  ;;  %532 = vst.msk [vmem:[#allocation2 + $0x4a] sm:$0xff] %vm529_vm5, %v1780_v18  ;;  %v1793_v21 = vld [vmem:[%s1741_s19 + $0x30] sm:$0xff]  ;;  %v538_v23 = vld [vmem:[#allocation2] sm:$0xff]  ;;  %s1635_s18 = smov 32   ;;  %vm594_vm7 = vcmask 64544  }
  0x46   : > { %621 = vrot.lane.b32.xlu1 %v604_v15, %s1628_s0  ;;  %535 = vst.msk [vmem:[#allocation2 + $0x6a] sm:$0xff] %vm529_vm5, %v1787_v19  ;;  %536 = vst.msk [vmem:[#allocation2 + $0x7a] sm:$0xff] %vm529_vm5, %v1793_v21  ;;  %v539_v24 = vld [vmem:[#allocation2 + $0x8] sm:$0xff]  ;;  %v556_v27 = vld [vmem:[#allocation2 + $0x1a] sm:$0xff]  ;;  %vm643_vm8 = vcmask 97344   ;;  %vm692_vm9 = vcmask 130144  }
  0x47   : > { %572 = vrot.lane.b32.xlu0 %v555_v16, %s1629_s24  ;;  %546 = vst.msk [vmem:[#allocation3] sm:$0xff] %vm529_vm5, %v538_v23  ;;  %547 = vst.msk [vmem:[#allocation3 + $0x8] sm:$0xff] %vm529_vm5, %v539_v24  ;;  %v540_v33 = vld [vmem:[#allocation2 + $0x18] sm:$0xff]  ;;  %v541_v34 = vld [vmem:[#allocation2 + $0x20] sm:$0xff]  ;;  %vm741_vm10 = vcmask 162944   ;;  %vm790_vm11 = vcmask 195744  }
  0x48   : > { %v605_v35 = vld [vmem:[#allocation2 + $0x1c] sm:$0xff]  ;;  %548 = vst.msk [vmem:[#allocation3 + $0x10] sm:$0xff] %vm529_vm5, %v540_v33  ;;  %549 = vst.msk [vmem:[#allocation3 + $0x18] sm:$0xff] %vm529_vm5, %v541_v34  ;;  %v606_v39 = vld [vmem:[#allocation2 + $0x24] sm:$0xff]  ;;  %vm840_vm12 = vcmask 228544   ;;  %vm889_vm13 = vcmask 261344  }
  0x49   : > { %v557_v36 = vld [vmem:[#allocation2 + $0x22] sm:$0xff]  ;;  %v958_v44 = vld [vmem:[%s2026_s3 + $0x18] sm:$0xff]  ;;  %v957_v45 = vld [vmem:[%s2026_s3 + $0x10] sm:$0xff]  ;;  %vm938_vm14 = vcmask 294144   ;;  %vm967_vm15 = vcmask 293888  }
  0x4a   : > { %v959_v42 = vld [vmem:[%s2026_s3 + $0x20] sm:$0xf]  ;;  %v956_v48 = vld [vmem:[%s2026_s3 + $0x8] sm:$0xff]  ;;  %v704_v50 = vld [vmem:[#allocation2 + $0x52] sm:$0xff] }
  0x4b   : > { %v653_v25 = vld [vmem:[#allocation2 + $0x38] sm:$0xff]  ;;  %v652_v26 = vld [vmem:[#allocation2 + $0x30] sm:$0xff]  ;;  %1498 = vmatprep.subr.msk.mxu0 %vm992_vm6, %v959_v42  ;;  %v955_v49 = vld [vmem:[%s2026_s3] sm:$0xff] }
  0x4c   : > { %670 = vrot.lane.b32.xlu1 %v653_v25, %s1630_s7  ;;  %668 = vrot.lane.b32.xlu0 %v652_v26, %s1630_s7  ;;  %550 = vst.msk [vmem:[#allocation3 + $0x20] sm:$0xff] %vm529_vm5, %v652_v26  ;;  %551 = vst.msk [vmem:[#allocation3 + $0x28] sm:$0xff] %vm529_vm5, %v653_v25  ;;  %v701_v28 = vld [vmem:[#allocation2 + $0x32] sm:$0xff]  ;;  %v654_v29 = vld [vmem:[#allocation2 + $0x48] sm:$0xff] }
  0x4d   : > { %v655_v30 = vld [vmem:[#allocation2 + $0x50] sm:$0xff]  ;;  %552 = vst.msk [vmem:[#allocation3 + $0x30] sm:$0xff] %vm529_vm5, %v654_v29  ;;  %v702_v32 = vld [vmem:[#allocation2 + $0x3a] sm:$0xff]  ;;  %v849_v40 = vld [vmem:[#allocation2 + $0x62] sm:$0xff]  ;;  %1499 = vmatpush3.msk.msra.mxu0 %vm992_vm6, %v959_v42 }
  0x4e   : > { %553 = vst.msk [vmem:[#allocation3 + $0x38] sm:$0xff] %vm529_vm5, %v655_v30  ;;  %v750_v31 = vld [vmem:[#allocation2 + $0x34] sm:$0xff]  ;;  %v800_v37 = vld [vmem:[#allocation2 + $0x60] sm:$0xff]  ;;  %v801_v41 = vld [vmem:[#allocation2 + $0x68] sm:$0xff]  ;;  %1500 = vmatprep.subr.mxu0 %v958_v44 }
  0x4f   : > { %v751_v38 = vld [vmem:[#allocation2 + $0x3c] sm:$0xff]  ;;  %v703_v43 = vld [vmem:[#allocation2 + $0x4a] sm:$0xff]  ;;  %1501 = vmatpush3.msra.mxu0 %v958_v44  ;;  %v753_v54 = vld [vmem:[#allocation2 + $0x54] sm:$0xff] }
  0x50   : > { %574 = vrot.lane.b32.xlu1 %v556_v27, %s1629_s24  ;;  %717 = vrot.lane.b32.xlu0 %v701_v28, %s1631_s11  ;;  %v898_v46 = vld [vmem:[#allocation2 + $0x64] sm:$0xff]  ;;  %v899_v51 = vld [vmem:[#allocation2 + $0x6c] sm:$0xff]  ;;  %v802_v53 = vld [vmem:[#allocation2 + $0x78] sm:$0xff] }
  0x51   : > { %v850_v47 = vld [vmem:[#allocation2 + $0x6a] sm:$0xff]  ;;  %1502 = vmatprep.subr.mxu0 %v957_v45  ;;  %v851_v55 = vld [vmem:[#allocation2 + $0x7a] sm:$0xff]  ;;  %v852_v58 = vld [vmem:[#allocation2 + $0x82] sm:$0xff] }
  0x52   : > { %1503 = vmatpush3.msra.mxu0 %v957_v45  ;;  %v752_v52 = vld [vmem:[#allocation2 + $0x4c] sm:$0xff]  ;;  %v803_v56 = vld [vmem:[#allocation2 + $0x80] sm:$0xff]  ;;  %v805_v61 = vld [vmem:[#allocation2 + $0x98] sm:$0xff] }
  0x53   : > { %1504 = vmatprep.subr.mxu0 %v956_v48  ;;  %v900_v57 = vld [vmem:[#allocation2 + $0x7c] sm:$0xff]  ;;  %v901_v59 = vld [vmem:[#allocation2 + $0x84] sm:$0xff]  ;;  %v804_v60 = vld [vmem:[#allocation2 + $0x90] sm:$0xff] }
  0x54   : > { %766 = vrot.lane.b32.xlu1 %v750_v31, %s1632_s12  ;;  %719 = vrot.lane.b32.xlu0 %v702_v32, %s1631_s11  ;;  %v853_v62 = vld [vmem:[#allocation2 + $0x92] sm:$0xff]  ;;  %v854_v63 = vld [vmem:[#allocation2 + $0x9a] sm:$0xff]  ;;  %v806_v4 = vld [vmem:[#allocation2 + $0xa8] sm:$0xff] }
  0x55   : > { %1505 = vmatpush3.msra.mxu0 %v956_v48  ;;  %v902_v0 = vld [vmem:[#allocation2 + $0x94] sm:$0xff]  ;;  %v903_v1 = vld [vmem:[#allocation2 + $0x9c] sm:$0xff]  ;;  %v855_v8 = vld [vmem:[#allocation2 + $0xaa] sm:$0xff] }
  0x56   : > { %1506 = vmatprep.subr.mxu0 %v955_v49  ;;  %v807_v5 = vld [vmem:[#allocation2 + $0xb0] sm:$0xff] }
  0x57   : > { %1507 = vmatpush3.msra.mxu0 %v955_v49  ;;  %v856_v9 = vld [vmem:[#allocation2 + $0xb2] sm:$0xff] }
  0x58   : > { %623 = vrot.lane.b32.xlu1 %v605_v35, %s1628_s0  ;;  %576 = vrot.lane.b32.xlu0 %v557_v36, %s1629_s24  ;;  %v904_v10 = vld [vmem:[#allocation2 + $0xac] sm:$0xff]  ;;  %v905_v11 = vld [vmem:[#allocation2 + $0xb4] sm:$0xff] }
  0x5c   : > { %816 = vrot.lane.b32.xlu1 %v800_v37, %s1633_s15  ;;  %768 = vrot.lane.b32.xlu0 %v751_v38, %s1632_s12 }
  0x60   : > { %672 = vrot.lane.b32.xlu1 %v654_v29, %s1630_s7  ;;  %625 = vrot.lane.b32.xlu0 %v606_v39, %s1628_s0 }
  0x64   : > { %865 = vrot.lane.b32.xlu1 %v849_v40, %s1634_s25  ;;  %818 = vrot.lane.b32.xlu0 %v801_v41, %s1633_s15 }
  0x68   : > { %721 = vrot.lane.b32.xlu1 %v703_v43, %s1631_s11  ;;  %674 = vrot.lane.b32.xlu0 %v655_v30, %s1630_s7 }
  0x6c   : > { %914 = vrot.lane.b32.xlu1 %v898_v46, %s1635_s18  ;;  %867 = vrot.lane.b32.xlu0 %v850_v47, %s1634_s25 }
  0x70   : > { %723 = vrot.lane.b32.xlu1 %v704_v50, %s1631_s11  ;;  %578 = vrot.lane.b32.xlu0 %v701_v28, %s1629_s24 }
  0x74   : > { %916 = vrot.lane.b32.xlu1 %v899_v51, %s1635_s18  ;;  %770 = vrot.lane.b32.xlu0 %v752_v52, %s1632_s12 }
  0x78   : > { %627 = vrot.lane.b32.xlu1 %v750_v31, %s1628_s0  ;;  %580 = vrot.lane.b32.xlu0 %v702_v32, %s1629_s24 }
  0x7c   : > { %820 = vrot.lane.b32.xlu1 %v802_v53, %s1633_s15  ;;  %772 = vrot.lane.b32.xlu0 %v753_v54, %s1632_s12 }
  0x80   : > { %676 = vrot.lane.b32.xlu1 %v800_v37, %s1630_s7  ;;  %629 = vrot.lane.b32.xlu0 %v751_v38, %s1628_s0 }
  0x84   : > { %869 = vrot.lane.b32.xlu1 %v851_v55, %s1634_s25  ;;  %822 = vrot.lane.b32.xlu0 %v803_v56, %s1633_s15 }
  0x88   : > { %725 = vrot.lane.b32.xlu1 %v849_v40, %s1631_s11  ;;  %678 = vrot.lane.b32.xlu0 %v801_v41, %s1630_s7 }
  0x8c   : > { %918 = vrot.lane.b32.xlu1 %v900_v57, %s1635_s18  ;;  %871 = vrot.lane.b32.xlu0 %v852_v58, %s1634_s25 }
  0x90   : > { %727 = vrot.lane.b32.xlu1 %v850_v47, %s1631_s11  ;;  %582 = vrot.lane.b32.xlu0 %v703_v43, %s1629_s24 }
  0x94   : > { %920 = vrot.lane.b32.xlu1 %v901_v59, %s1635_s18  ;;  %774 = vrot.lane.b32.xlu0 %v898_v46, %s1632_s12 }
  0x98   : > { %584 = vrot.lane.b32.xlu0 %v704_v50, %s1629_s24  ;;  %631 = vrot.lane.b32.xlu1 %v752_v52, %s1628_s0 }
  0x9c   : > { %776 = vrot.lane.b32.xlu0 %v899_v51, %s1632_s12  ;;  %824 = vrot.lane.b32.xlu1 %v804_v60, %s1633_s15 }
  0xa0   : > { %633 = vrot.lane.b32.xlu0 %v753_v54, %s1628_s0  ;;  %680 = vrot.lane.b32.xlu1 %v802_v53, %s1630_s7 }
  0xa4   : > { %826 = vrot.lane.b32.xlu0 %v805_v61, %s1633_s15  ;;  %873 = vrot.lane.b32.xlu1 %v853_v62, %s1634_s25 }
  0xa8   : > { %682 = vrot.lane.b32.xlu0 %v803_v56, %s1630_s7  ;;  %729 = vrot.lane.b32.xlu1 %v851_v55, %s1631_s11 }
  0xac   : > { %875 = vrot.lane.b32.xlu0 %v854_v63, %s1634_s25  ;;  %922 = vrot.lane.b32.xlu1 %v902_v0, %s1635_s18 }
  0xb0   : > { %731 = vrot.lane.b32.xlu0 %v852_v58, %s1631_s11  ;;  %778 = vrot.lane.b32.xlu1 %v900_v57, %s1632_s12 }
  0xb4   : > { %924 = vrot.lane.b32.xlu0 %v903_v1, %s1635_s18  ;;  %780 = vrot.lane.b32.xlu1 %v901_v59, %s1632_s12  ;;  %v620_v2 = vpop.permute.xlu1 %619 }
  0xb5   : > { %v571_v3 = vpop.permute.xlu0 %570 }
  0xb6   : > { %595 = vst.msk [vmem:[#allocation3] sm:$0xff] %vm594_vm7, %v571_v3 }
  0xb7   : > { %644 = vst.msk [vmem:[#allocation3] sm:$0xff] %vm643_vm8, %v620_v2 }
  0xb8   : > { %828 = vrot.lane.b32.xlu0 %v806_v4, %s1633_s15  ;;  %830 = vrot.lane.b32.xlu1 %v807_v5, %s1633_s15  ;;  %v622_v6 = vpop.permute.xlu1 %621 }
  0xb9   : > { %v573_v7 = vpop.permute.xlu0 %572 }
  0xba   : > { %596 = vst.msk [vmem:[#allocation3 + $0x8] sm:$0xff] %vm594_vm7, %v573_v7 }
  0xbb   : > { %645 = vst.msk [vmem:[#allocation3 + $0x8] sm:$0xff] %vm643_vm8, %v622_v6 }
  0xbc   : > { %877 = vrot.lane.b32.xlu0 %v855_v8, %s1634_s25  ;;  %879 = vrot.lane.b32.xlu1 %v856_v9, %s1634_s25 }
  0xbe   : > { %v671_v12 = vpop.permute.xlu1 %670  ;;  %v669_v15 = vpop.permute.xlu0 %668 }
  0xbf   : > { %694 = vst.msk [vmem:[#allocation3 + $0x8] sm:$0xff] %vm692_vm9, %v671_v12  ;;  %693 = vst.msk [vmem:[#allocation3] sm:$0xff] %vm692_vm9, %v669_v15 }
  0xc0   : > { %926 = vrot.lane.b32.xlu0 %v904_v10, %s1635_s18  ;;  %928 = vrot.lane.b32.xlu1 %v905_v11, %s1635_s18 }
  0xc2   : > { %v575_v16 = vpop.permute.xlu1 %574  ;;  %v718_v23 = vpop.permute.xlu0 %717 }
  0xc3   : > { %597 = vst.msk [vmem:[#allocation3 + $0x10] sm:$0xff] %vm594_vm7, %v575_v16 }
  0xc4   : > { %742 = vst.msk [vmem:[#allocation3] sm:$0xff] %vm741_vm10, %v718_v23 }
  0xc6   : > { %v767_v24 = vpop.permute.xlu1 %766  ;;  %v720_v25 = vpop.permute.xlu0 %719 }
  0xc7   : > { %791 = vst.msk [vmem:[#allocation3] sm:$0xff] %vm790_vm11, %v767_v24 }
  0xc8   : > { %743 = vst.msk [vmem:[#allocation3 + $0x8] sm:$0xff] %vm741_vm10, %v720_v25 }
  0xca   : > { %v624_v26 = vpop.permute.xlu1 %623  ;;  %v577_v27 = vpop.permute.xlu0 %576 }
  0xcb   : > { %646 = vst.msk [vmem:[#allocation3 + $0x10] sm:$0xff] %vm643_vm8, %v624_v26 }
  0xcc   : > { %598 = vst.msk [vmem:[#allocation3 + $0x18] sm:$0xff] %vm594_vm7, %v577_v27 }
  0xce   : > { %v817_v28 = vpop.permute.xlu1 %816  ;;  %v769_v29 = vpop.permute.xlu0 %768 }
  0xcf   : > { %841 = vst.msk [vmem:[#allocation3] sm:$0xff] %vm840_vm12, %v817_v28 }
  0xd0   : > { %792 = vst.msk [vmem:[#allocation3 + $0x8] sm:$0xff] %vm790_vm11, %v769_v29 }
  0xd2   : > { %v673_v30 = vpop.permute.xlu1 %672  ;;  %v626_v31 = vpop.permute.xlu0 %625 }
  0xd3   : > { %695 = vst.msk [vmem:[#allocation3 + $0x10] sm:$0xff] %vm692_vm9, %v673_v30  ;;  %v1109_v30 = vld [vmem:[%s2028_s5] sm:$0xf] }
  0xd4   : > { %647 = vst.msk [vmem:[#allocation3 + $0x18] sm:$0xff] %vm643_vm8, %v626_v31  ;;  %1520 = vmatprep.subr.msk.mxu1 %vm992_vm6, %v1109_v30 }
  0xd5   : > { %1521 = vmatpush3.msk.msra.mxu1 %vm992_vm6, %v1109_v30 }
  0xd6   : > { %v866_v32 = vpop.permute.xlu1 %865  ;;  %v819_v33 = vpop.permute.xlu0 %818 }
  0xd7   : > { %890 = vst.msk [vmem:[#allocation3] sm:$0xff] %vm889_vm13, %v866_v32 }
  0xd8   : > { %842 = vst.msk [vmem:[#allocation3 + $0x8] sm:$0xff] %vm840_vm12, %v819_v33  ;;  %v1448_v33 = vld [vmem:[%s2027_s4] ss:$0 sm:$0xff] }
  0xda   : > { %v722_v34 = vpop.permute.xlu1 %721  ;;  %v675_v35 = vpop.permute.xlu0 %674 }
  0xdb   : > { %744 = vst.msk [vmem:[#allocation3 + $0x10] sm:$0xff] %vm741_vm10, %v722_v34 }
  0xdc   : > { %696 = vst.msk [vmem:[#allocation3 + $0x18] sm:$0xff] %vm692_vm9, %v675_v35 }
  0xde   : > { %v915_v36 = vpop.permute.xlu1 %914  ;;  %v868_v37 = vpop.permute.xlu0 %867 }
  0xdf   : > { %939 = vst.msk [vmem:[#allocation3] sm:$0xff] %vm938_vm14, %v915_v36 }
  0xe0   : > { %891 = vst.msk [vmem:[#allocation3 + $0x8] sm:$0xff] %vm889_vm13, %v868_v37 }
  0xe2   : > { %v724_v38 = vpop.permute.xlu1 %723  ;;  %v579_v39 = vpop.permute.xlu0 %578 }
  0xe3   : > { %745 = vst.msk [vmem:[#allocation3 + $0x18] sm:$0xff] %vm741_vm10, %v724_v38 }
  0xe4   : > { %599 = vst.msk [vmem:[#allocation3 + $0x20] sm:$0xff] %vm594_vm7, %v579_v39 }
  0xe6   : > { %v917_v40 = vpop.permute.xlu1 %916  ;;  %v771_v41 = vpop.permute.xlu0 %770  ;;  %v947_v42 = vld [vmem:[#allocation3] sm:$0xff] }
  0xe7   : > { %940 = vst.msk [vmem:[#allocation3 + $0x8] sm:$0xff] %vm938_vm14, %v917_v40  ;;  %1508 = vmatprep.mubr.msk.f32.mxu0 %vm967_vm15, %v947_v42 }
  0xe8   : > { %793 = vst.msk [vmem:[#allocation3 + $0x10] sm:$0xff] %vm790_vm11, %v771_v41 }
  0xea   : > { %v628_v43 = vpop.permute.xlu1 %627  ;;  %v581_v44 = vpop.permute.xlu0 %580 }
  0xeb   : > { %648 = vst.msk [vmem:[#allocation3 + $0x20] sm:$0xff] %vm643_vm8, %v628_v43 }
  0xec   : > { %600 = vst.msk [vmem:[#allocation3 + $0x28] sm:$0xff] %vm594_vm7, %v581_v44 }
  0xee   : > { %v821_v45 = vpop.permute.xlu1 %820  ;;  %v773_v46 = vpop.permute.xlu0 %772  ;;  %v948_v47 = vld [vmem:[#allocation3 + $0x8] sm:$0xff] }
  0xef   : > { %843 = vst.msk [vmem:[#allocation3 + $0x10] sm:$0xff] %vm840_vm12, %v821_v45  ;;  %1509 = vmatmul.mubr.msk.f32.vlgmr.msra.gmra.mxu0 %vm967_vm15, %v948_v47 }
  0xf0   : > { %794 = vst.msk [vmem:[#allocation3 + $0x18] sm:$0xff] %vm790_vm11, %v773_v46 }
  0xf2   : > { %v677_v48 = vpop.permute.xlu1 %676  ;;  %v630_v49 = vpop.permute.xlu0 %629 }
  0xf3   : > { %697 = vst.msk [vmem:[#allocation3 + $0x20] sm:$0xff] %vm692_vm9, %v677_v48 }
  0xf4   : > { %649 = vst.msk [vmem:[#allocation3 + $0x28] sm:$0xff] %vm643_vm8, %v630_v49 }
  0xf6   : > { %v870_v50 = vpop.permute.xlu1 %869  ;;  %v823_v51 = vpop.permute.xlu0 %822 }
  0xf7   : > { %892 = vst.msk [vmem:[#allocation3 + $0x10] sm:$0xff] %vm889_vm13, %v870_v50 }
  0xf8   : > { %844 = vst.msk [vmem:[#allocation3 + $0x18] sm:$0xff] %vm840_vm12, %v823_v51 }
  0xfa   : > { %v726_v52 = vpop.permute.xlu1 %725  ;;  %v679_v53 = vpop.permute.xlu0 %678 }
  0xfb   : > { %746 = vst.msk [vmem:[#allocation3 + $0x20] sm:$0xff] %vm741_vm10, %v726_v52 }
  0xfc   : > { %698 = vst.msk [vmem:[#allocation3 + $0x28] sm:$0xff] %vm692_vm9, %v679_v53 }
  0xfe   : > { %v919_v54 = vpop.permute.xlu1 %918  ;;  %v872_v55 = vpop.permute.xlu0 %871 }
  0xff   : > { %941 = vst.msk [vmem:[#allocation3 + $0x10] sm:$0xff] %vm938_vm14, %v919_v54 }
 0x100   : > { %893 = vst.msk [vmem:[#allocation3 + $0x18] sm:$0xff] %vm889_vm13, %v872_v55 }
 0x102   : > { %v728_v56 = vpop.permute.xlu1 %727  ;;  %v583_v57 = vpop.permute.xlu0 %582 }
 0x103   : > { %747 = vst.msk [vmem:[#allocation3 + $0x28] sm:$0xff] %vm741_vm10, %v728_v56 }
 0x104   : > { %601 = vst.msk [vmem:[#allocation3 + $0x30] sm:$0xff] %vm594_vm7, %v583_v57 }
 0x106   : > { %v921_v58 = vpop.permute.xlu1 %920  ;;  %v775_v59 = vpop.permute.xlu0 %774  ;;  %v949_v60 = vld [vmem:[#allocation3 + $0x10] sm:$0xff] }
 0x107   : > { %942 = vst.msk [vmem:[#allocation3 + $0x18] sm:$0xff] %vm938_vm14, %v921_v58  ;;  %1511 = vmatprep.mubr.msk.f32.mxu0 %vm967_vm15, %v949_v60  ;;  %v1458_v58 = vld [vmem:[%s2029_s6] ss:$0 sm:$0xff] }
 0x108   : > { %795 = vst.msk [vmem:[#allocation3 + $0x20] sm:$0xff] %vm790_vm11, %v775_v59 }
 0x10a   : > { %v585_v61 = vpop.permute.xlu0 %584  ;;  %v632_v62 = vpop.permute.xlu1 %631 }
 0x10b   : > { %602 = vst.msk [vmem:[#allocation3 + $0x38] sm:$0xff] %vm594_vm7, %v585_v61 }
 0x10c   : > { %650 = vst.msk [vmem:[#allocation3 + $0x30] sm:$0xff] %vm643_vm8, %v632_v62 }
 0x10e   : > { %v777_v63 = vpop.permute.xlu0 %776  ;;  %v825_v0 = vpop.permute.xlu1 %824  ;;  %v950_v1 = vld [vmem:[#allocation3 + $0x18] sm:$0xff] }
 0x10f   : > { %796 = vst.msk [vmem:[#allocation3 + $0x28] sm:$0xff] %vm790_vm11, %v777_v63  ;;  %1512 = vmatmul.mubr.msk.f32.gmra.mxu0 %vm967_vm15, %v950_v1 }
 0x110   : > { %845 = vst.msk [vmem:[#allocation3 + $0x20] sm:$0xff] %vm840_vm12, %v825_v0 }
 0x112   : > { %v634_v2 = vpop.permute.xlu0 %633  ;;  %v681_v3 = vpop.permute.xlu1 %680 }
 0x113   : > { %651 = vst.msk [vmem:[#allocation3 + $0x38] sm:$0xff] %vm643_vm8, %v634_v2 }
 0x114   : > { %699 = vst.msk [vmem:[#allocation3 + $0x30] sm:$0xff] %vm692_vm9, %v681_v3 }
 0x116   : > { %v827_v4 = vpop.permute.xlu0 %826  ;;  %v874_v5 = vpop.permute.xlu1 %873 }
 0x117   : > { %846 = vst.msk [vmem:[#allocation3 + $0x28] sm:$0xff] %vm840_vm12, %v827_v4 }
 0x118   : > { %894 = vst.msk [vmem:[#allocation3 + $0x20] sm:$0xff] %vm889_vm13, %v874_v5 }
 0x11a   : > { %v683_v6 = vpop.permute.xlu0 %682  ;;  %v730_v7 = vpop.permute.xlu1 %729 }
 0x11b   : > { %700 = vst.msk [vmem:[#allocation3 + $0x38] sm:$0xff] %vm692_vm9, %v683_v6 }
 0x11c   : > { %748 = vst.msk [vmem:[#allocation3 + $0x30] sm:$0xff] %vm741_vm10, %v730_v7 }
 0x11e   : > { %v876_v8 = vpop.permute.xlu0 %875  ;;  %v923_v9 = vpop.permute.xlu1 %922 }
 0x11f   : > { %895 = vst.msk [vmem:[#allocation3 + $0x28] sm:$0xff] %vm889_vm13, %v876_v8 }
 0x120   : > { %943 = vst.msk [vmem:[#allocation3 + $0x20] sm:$0xff] %vm938_vm14, %v923_v9 }
 0x122   : > { %v732_v10 = vpop.permute.xlu0 %731  ;;  %v779_v11 = vpop.permute.xlu1 %778 }
 0x123   : > { %749 = vst.msk [vmem:[#allocation3 + $0x38] sm:$0xff] %vm741_vm10, %v732_v10 }
 0x124   : > { %797 = vst.msk [vmem:[#allocation3 + $0x30] sm:$0xff] %vm790_vm11, %v779_v11 }
 0x126   : > { %v925_v12 = vpop.permute.xlu0 %924  ;;  %v781_v15 = vpop.permute.xlu1 %780 }
 0x127   : > { %v951_v16 = vld [vmem:[#allocation3 + $0x20] sm:$0xff]  ;;  %944 = vst.msk [vmem:[#allocation3 + $0x28] sm:$0xff] %vm938_vm14, %v925_v12 }
 0x128   : > { %798 = vst.msk [vmem:[#allocation3 + $0x38] sm:$0xff] %vm790_vm11, %v781_v15  ;;  %1514 = vmatprep.mubr.msk.f32.mxu0 %vm967_vm15, %v951_v16 }
 0x12a   : > { %v829_v23 = vpop.permute.xlu0 %828  ;;  %v831_v24 = vpop.permute.xlu1 %830 }
 0x12b   : > { %847 = vst.msk [vmem:[#allocation3 + $0x30] sm:$0xff] %vm840_vm12, %v829_v23  ;;  %848 = vst.msk [vmem:[#allocation3 + $0x38] sm:$0xff] %vm840_vm12, %v831_v24 }
 0x12e   : > { %v878_v25 = vpop.permute.xlu0 %877  ;;  %v880_v26 = vpop.permute.xlu1 %879  ;;  %v952_v27 = vld [vmem:[#allocation3 + $0x28] sm:$0xff] }
 0x12f   : > { %896 = vst.msk [vmem:[#allocation3 + $0x30] sm:$0xff] %vm889_vm13, %v878_v25  ;;  %897 = vst.msk [vmem:[#allocation3 + $0x38] sm:$0xff] %vm889_vm13, %v880_v26  ;;  %1515 = vmatmul.mubr.msk.f32.gmra.mxu0 %vm967_vm15, %v952_v27 }
 0x132   : > { %v927_v28 = vpop.permute.xlu0 %926  ;;  %v929_v29 = vpop.permute.xlu1 %928 }
 0x133   : > { %945 = vst.msk [vmem:[#allocation3 + $0x30] sm:$0xff] %vm938_vm14, %v927_v28  ;;  %946 = vst.msk [vmem:[#allocation3 + $0x38] sm:$0xff] %vm938_vm14, %v929_v29 }
 0x13a   : > { %v953_v31 = vld [vmem:[#allocation3 + $0x30] sm:$0xff]  ;;  %v954_v32 = vld [vmem:[#allocation3 + $0x38] sm:$0xff] }
 0x13b   : > { %1517 = vmatprep.mubr.msk.f32.mxu0 %vm967_vm15, %v953_v31 }
 0x13c   : > { %1518 = vmatmul.mubr.msk.f32.gmra.mxu0 %vm967_vm15, %v954_v32 }
 0x1af   : > { %v1510_v34 = vpop.f32.mrf.mxu0 }
 0x1b0   : > { %v1068_v35 = vadd.f32 %v1510_v34, %v1448_v33 }
 0x1b1   : > { %v1062_v36 = vpop.f32.mrf.mxu0 }
 0x1b2   : > { %v1063_v37 = vadd.f32 %v1448_v33, %v1062_v36  ;;  %v1102_v39 = vmax.f32 %v1068_v35, 0.0 }
 0x1b4   : > { %v1101_v38 = vmax.f32 %v1063_v37, 0.0 }
 0x1b6   : > { %1522 = vmatprep.mubr.msk.f32.mxu1 %vm529_vm5, %v1101_v38 }
 0x1b7   : > { %1523 = vmatmul.mubr.msk.f32.vlgmr.msra.gmra.mxu1 %vm529_vm5, %v1102_v39 }
 0x1cf   : > { %v1513_v40 = vpop.f32.mrf.mxu0 }
 0x1d0   : > { %v1078_v41 = vadd.f32 %v1513_v40, %v1448_v33 }
 0x1d1   : > { %v1072_v42 = vpop.f32.mrf.mxu0 }
 0x1d2   : > { %v1073_v43 = vadd.f32 %v1448_v33, %v1072_v42  ;;  %v1104_v45 = vmax.f32 %v1078_v41, 0.0 }
 0x1d4   : > { %v1103_v44 = vmax.f32 %v1073_v43, 0.0 }
 0x1d6   : > { %1525 = vmatprep.mubr.msk.f32.mxu1 %vm529_vm5, %v1103_v44 }
 0x1d7   : > { %1526 = vmatmul.mubr.msk.f32.gmra.mxu1 %vm529_vm5, %v1104_v45 }
 0x1ef   : > { %v1516_v46 = vpop.f32.mrf.mxu0 }
 0x1f0   : > { %v1088_v47 = vadd.f32 %v1516_v46, %v1448_v33 }
 0x1f1   : > { %v1082_v48 = vpop.f32.mrf.mxu0 }
 0x1f2   : > { %v1083_v49 = vadd.f32 %v1448_v33, %v1082_v48  ;;  %v1106_v51 = vmax.f32 %v1088_v47, 0.0 }
 0x1f4   : > { %v1105_v50 = vmax.f32 %v1083_v49, 0.0 }
 0x1f6   : > { %1528 = vmatprep.mubr.msk.f32.mxu1 %vm529_vm5, %v1105_v50 }
 0x1f7   : > { %1529 = vmatmul.mubr.msk.f32.gmra.mxu1 %vm529_vm5, %v1106_v51 }
 0x1fc   : > { %v1519_v52 = vpop.f32.mrf.mxu0 }
 0x1fd   : > { %v1098_v53 = vadd.f32 %v1519_v52, %v1448_v33 }
 0x1fe   : > { %v1092_v54 = vpop.f32.mrf.mxu0 }
 0x1ff   : > { %v1093_v55 = vadd.f32 %v1448_v33, %v1092_v54  ;;  %v1108_v57 = vmax.f32 %v1098_v53, 0.0 }
 0x201   : > { %v1107_v56 = vmax.f32 %v1093_v55, 0.0 }
 0x203   : > { %1531 = vmatprep.mubr.msk.f32.mxu1 %vm529_vm5, %v1107_v56 }
 0x204   : > { %1532 = vmatmul.mubr.msk.f32.gmra.mxu1 %vm529_vm5, %v1108_v57 }
 0x277   : > { %v1524_v59 = vpop.f32.mrf.mxu1 }
 0x278   : > { %v1216_v60 = vadd.f32 %v1524_v59, %v1458_v58 }
 0x279   : > { %v1210_v61 = vpop.f32.mrf.mxu1 }
 0x27a   : > { %v1258_v62 = vadd.f32 %v1216_v60, %v1770_v14  ;;  %v1211_v63 = vadd.f32 %v1458_v58, %v1210_v61 }
 0x27c   : > { %1266 = vst.msk [vmem:[%s1746_s22 + $0x8] sm:$0xff] %vm529_vm5, %v1258_v62  ;;  %v1257_v0 = vadd.f32 %v1211_v63, %v1767_v13 }
 0x27e   : > { %1265 = vst.msk [vmem:[%s1746_s22] sm:$0xff] %vm529_vm5, %v1257_v0 }
 0x297   : > { %v1527_v1 = vpop.f32.mrf.mxu1 }
 0x298   : > { %v1226_v2 = vadd.f32 %v1527_v1, %v1458_v58 }
 0x299   : > { %v1220_v3 = vpop.f32.mrf.mxu1 }
 0x29a   : > { %v1260_v4 = vadd.f32 %v1226_v2, %v1790_v20  ;;  %v1221_v5 = vadd.f32 %v1458_v58, %v1220_v3 }
 0x29c   : > { %1268 = vst.msk [vmem:[%s1746_s22 + $0x18] sm:$0xff] %vm529_vm5, %v1260_v4  ;;  %v1259_v14 = vadd.f32 %v1221_v5, %v1780_v18 }
 0x29e   : > { %1267 = vst.msk [vmem:[%s1746_s22 + $0x10] sm:$0xff] %vm529_vm5, %v1259_v14 }
 0x2b7   : > { %v1530_v6 = vpop.f32.mrf.mxu1 }
 0x2b8   : > { %v1236_v7 = vadd.f32 %v1530_v6, %v1458_v58 }
 0x2b9   : > { %v1230_v13 = vpop.f32.mrf.mxu1 }
 0x2ba   : > { %v1262_v8 = vadd.f32 %v1236_v7, %v1787_v19  ;;  %v1231_v9 = vadd.f32 %v1458_v58, %v1230_v13 }
 0x2bc   : > { %1270 = vst.msk [vmem:[%s1746_s22 + $0x28] sm:$0xff] %vm529_vm5, %v1262_v8  ;;  %v1261_v10 = vadd.f32 %v1231_v9, %v1777_v17 }
 0x2be   : > { %1269 = vst.msk [vmem:[%s1746_s22 + $0x20] sm:$0xff] %vm529_vm5, %v1261_v10 }
 0x2c4   : > { %v1533_v20 = vpop.f32.mrf.mxu1 }
 0x2c5   : > { %v1246_v11 = vadd.f32 %v1533_v20, %v1458_v58 }
 0x2c6   : > { %v1240_v12 = vpop.f32.mrf.mxu1 }
 0x2c7   : > { %v1264_v18 = vadd.f32 %v1246_v11, %v1804_v22  ;;  %v1241_v15 = vadd.f32 %v1458_v58, %v1240_v12 }
 0x2c9   : > { %1272 = vst.msk [vmem:[%s1746_s22 + $0x38] sm:$0xff] %vm529_vm5, %v1264_v18  ;;  %v1263_v16 = vadd.f32 %v1241_v15, %v1793_v21 }
 0x2cb   : > { %1271 = vst.msk [vmem:[%s1746_s22 + $0x30] sm:$0xff] %vm529_vm5, %v1263_v16 }
 0x2cc PF: > { %s17_s28 = sadd.s32 1, %s1623_s28   ;;  %s2036_s24 = smov %s1615_s26 }
 0x2cd   : > { %p14_p1 = scmp.ge.s32.totalorder %s17_s28, 10   ;;  %s2037_s25 = smov %s1619_s27 }
 0x2ce   : > { %s2038_s26 = smov %s2041_s29  ;;  %s2039_s27 = smov %s2045_s30 }
 0x2cf   :  { %16 = sbr.rel (!%p14_p1) target bundleno = 4 (0x4), region = 104 }

</bundles_post_ra>
